<compile_context>
chip_gen: v7x
topology: tpu7x:2x2x1
jax: 0.10.0
libtpu: 0.0.40
codegen_flags: <defaults>
</compile_context>

<pallas_src>
import functools

import jax
import jax.numpy as jnp
from jax import lax
from jax.experimental import pallas as pl
from jax.experimental.pallas import tpu as pltpu

OBS_SHAPE = (7, 15)                          # 7 * 15 = 105 (matches view(1, 105))
IN_FEATURES = OBS_SHAPE[0] * OBS_SHAPE[1]    # 105
H1, H2 = 128, 64
ACTION_SHAPE = 6

PAD = 128            # lane-dense padded feature width used for every layer
OUT_PAD = 8          # output lanes written back (6 actions + 2 zero pad lanes)
MAX_TILE = 1024      # mem-bound sweet spot; VMEM footprint is trivial at this size
NEG_INF = -1e30      # finite "-inf" for masked padded logits (exp underflows to 0)


def actor_kernel(x_ref, w_ref, b_ref, out_ref):
    # x_ref  : (tile, PAD)    bf16  (obs zero-padded 105 -> 128, pre-cast in wrapper)
    # w_ref  : (3, PAD, PAD)  bf16  (w1, w2, w3 zero-padded into 128x128 slabs)
    # b_ref  : (3, PAD)       f32   (b1, b2, b3 zero-padded to 128 lanes)
    # out_ref: (tile, OUT_PAD) f32  (softmax probs in lanes [0, ACTION_SHAPE))
    x = x_ref[...]                                        # bf16, no in-kernel cast
    b = b_ref[...]                                        # (3, PAD) f32

    h1 = jnp.dot(x, w_ref[0], preferred_element_type=jnp.float32)
    h1 = jnp.maximum(h1 + b[0:1, :], 0.0)                 # ReLU(fc1), f32

    h2 = jnp.dot(h1.astype(jnp.bfloat16), w_ref[1],
                 preferred_element_type=jnp.float32)
    h2 = jnp.maximum(h2 + b[1:2, :], 0.0)                 # ReLU(fc2), f32

    z = jnp.dot(h2.astype(jnp.bfloat16), w_ref[2],
                preferred_element_type=jnp.float32)
    z = z + b[2:3, :]                                     # fc3 logits, padded to 128

    # Mask the 122 padded lanes so they don't dilute the softmax.
    lane = lax.broadcasted_iota(jnp.int32, z.shape, 1)
    z = jnp.where(lane < ACTION_SHAPE, z, NEG_INF)

    # Numerically stable softmax; exact f32 division (not pl.reciprocal approx)
    # because downstream PPO probability ratios care about precision.
    m = jnp.max(z, axis=-1, keepdims=True)
    e = jnp.exp(z - m)
    probs = e / jnp.sum(e, axis=-1, keepdims=True)
    out_ref[...] = probs[:, :OUT_PAD]                     # only 8 lanes hit HBM


def pack_params(params):
    """Pack (w1,b1,w2,b2,w3,b3) into one bf16 weight slab + one f32 bias slab."""
    w1, b1, w2, b2, w3, b3 = params
    w = jnp.zeros((3, PAD, PAD), jnp.float32)
    w = w.at[0, :IN_FEATURES, :H1].set(w1)        # (105,128) -> slab 0
    w = w.at[1, :H1, :H2].set(w2)                 # (128, 64) -> slab 1
    w = w.at[2, :H2, :ACTION_SHAPE].set(w3)       # ( 64,  6) -> slab 2
    b = jnp.zeros((3, PAD), jnp.float32)
    b = b.at[0, :H1].set(b1.reshape(-1))
    b = b.at[1, :H2].set(b2.reshape(-1))
    b = b.at[2, :ACTION_SHAPE].set(b3.reshape(-1))
    return w.astype(jnp.bfloat16), b


def _round_up(v, m):
    return ((v + m - 1) // m) * m


def _pick_batch_tile(batch_rows):
    """Adaptive M tile.

    B <= 64 : small-batch fast path -- one tiny tile (B=1 inference latency).
    B  > 64 : ~half the batch per tile (>=2 tiles => both v7x TensorCores via
              the 'parallel' axis), rounded to a sublane multiple, capped at
              MAX_TILE where the kernel sits at the HBM roofline.
    """
    if batch_rows <= 64:
        return max(8, _round_up(batch_rows, 8))
    return int(min(MAX_TILE, _round_up(pl.cdiv(batch_rows, 2), 8)))


@functools.partial(jax.jit, static_argnames=("batch_tile",))
def _actor_forward_padded(x_pad, w_slab, b_slab, batch_tile):
    """x_pad: (n_tiles*batch_tile, PAD) bf16, already padded & cast."""
    b_pad = x_pad.shape[0]
    n_tiles = b_pad // batch_tile

    cost = pl.CostEstimate(
        flops=2 * b_pad * PAD * PAD * 3,
        transcendentals=b_pad * PAD,
        bytes_accessed=(b_pad * PAD * 2          # bf16 activations in
                        + b_pad * OUT_PAD * 4    # f32 probs out
                        + 3 * PAD * PAD * 2      # bf16 weight slab (resident)
                        + 3 * PAD * 4))          # f32 biases

    return pl.pallas_call(
        actor_kernel,
        out_shape=jax.ShapeDtypeStruct((b_pad, OUT_PAD), jnp.float32),
        grid=(n_tiles,),
        in_specs=[
            pl.BlockSpec((batch_tile, PAD), lambda i: (i, 0)),   # activations
            pl.BlockSpec((3, PAD, PAD), lambda i: (0, 0, 0)),    # weights, resident
            pl.BlockSpec((3, PAD), lambda i: (0, 0)),            # biases, resident
        ],
        out_specs=pl.BlockSpec((batch_tile, OUT_PAD), lambda i: (i, 0)),
        compiler_params=pltpu.CompilerParams(
            dimension_semantics=("parallel",)),   # shard batch tiles across TCs
        cost_estimate=cost,
    )(x_pad, w_slab, b_slab)


def actor_forward(x, w_slab, b_slab):
    """x: (B, 105) batch of flat observations, or a single OBS_SHAPE observation.

    Returns (B, ACTION_SHAPE) softmax probabilities (the tensor torch would pass
    to Categorical(logits=...)).
    """
    x = jnp.asarray(x, jnp.float32)
    if not (x.ndim == 2 and x.shape[1] == IN_FEATURES):
        x = x.reshape(1, IN_FEATURES)             # matches torch's x.view(1, 105)
    b_rows = x.shape[0]

    batch_tile = _pick_batch_tile(b_rows)
    n_tiles = pl.cdiv(b_rows, batch_tile)
    b_pad = n_tiles * batch_tile

    # Zero-pad batch to the M tile, features 105 -> 128, and cast to bf16 in one
    # fused producer op (no separate f32 HBM pass for the padded activations).
    x_pad = jnp.zeros((b_pad, PAD), jnp.bfloat16)
    x_pad = x_pad.at[:b_rows, :IN_FEATURES].set(x.astype(jnp.bfloat16))

    out = _actor_forward_padded(x_pad, w_slab, b_slab, batch_tile)
    return out[:b_rows, :ACTION_SHAPE]


def actor_reference(x, params):
    """Pure-JAX reference with the same bf16-matmul / f32-accumulate numerics."""
    w1, b1, w2, b2, w3, b3 = params
    x = jnp.asarray(x, jnp.float32).reshape(-1, IN_FEATURES)

    def lin(a, w, b):
        return jnp.dot(a.astype(jnp.bfloat16), w.astype(jnp.bfloat16),
                       preferred_element_type=jnp.float32) + b

    h1 = jnp.maximum(lin(x, w1, b1), 0.0)
    h2 = jnp.maximum(lin(h1, w2, b2), 0.0)
    z = lin(h2, w3, b3)
    return jax.nn.softmax(z, axis=-1)


def init_params(key):
    """nn.Linear-style init (uniform +/- 1/sqrt(fan_in)); weights stored (in, out)."""
    ks = jax.random.split(key, 6)

    def linear(kw, kb, fan_in, fan_out):
        bound = 1.0 / jnp.sqrt(float(fan_in))
        w = jax.random.uniform(kw, (fan_in, fan_out), jnp.float32, -bound, bound)
        b = jax.random.uniform(kb, (1, fan_out), jnp.float32, -bound, bound)
        return w, b

    w1, b1 = linear(ks[0], ks[1], IN_FEATURES, H1)
    w2, b2 = linear(ks[2], ks[3], H1, H2)
    w3, b3 = linear(ks[4], ks[5], H2, ACTION_SHAPE)
    return (w1, b1, w2, b2, w3, b3)


if __name__ == "__main__":
    key = jax.random.PRNGKey(0)
    k_obs, k_batch, k_small, k_params = jax.random.split(key, 4)

    params = init_params(k_params)
    w_slab, b_slab = pack_params(params)

    # 1) Single observation, exactly as the torch forward (view(1, 105)).
    #    Exercises the small-batch fast path (tile = 8 rows).
    x = jax.random.normal(k_obs, OBS_SHAPE, dtype=jnp.float32)       # (7, 15)
    probs = jax.block_until_ready(actor_forward(x, w_slab, b_slab))
    assert probs.shape == (1, ACTION_SHAPE)
    assert abs(float(jnp.sum(probs)) - 1.0) < 1e-4
    ref = actor_reference(x, params)
    assert jnp.allclose(probs, ref, atol=1e-3), (probs, ref)

    # 2) Throughput path: 256 obs -> adaptive tile of 128 rows, 2 parallel tiles.
    xb = jax.random.normal(k_batch, (256, IN_FEATURES), dtype=jnp.float32)
    pb = jax.block_until_ready(actor_forward(xb, w_slab, b_slab))
    assert pb.shape == (256, ACTION_SHAPE)
    assert bool(jnp.allclose(jnp.sum(pb, axis=-1), 1.0, atol=1e-4))
    assert bool(jnp.allclose(pb, actor_reference(xb, params), atol=1e-3))

    # 3) Odd small batch (40 rows) -> single 40-row tile, padded rows ignored.
    xs = jax.random.normal(k_small, (40, IN_FEATURES), dtype=jnp.float32)
    ps = jax.block_until_ready(actor_forward(xs, w_slab, b_slab))
    assert ps.shape == (40, ACTION_SHAPE)
    assert bool(jnp.allclose(ps, actor_reference(xs, params), atol=1e-3))

    # TODO(synk): torch.distributions.Categorical sampling / log_prob is not
    # translated; the kernel returns the probability tensor fed to it.
    # (Could be fused in-kernel later via pltpu.prng_* + Gumbel-max.)
    print("KERNEL_OK")
</pallas_src>

<mosaic_0001>
module attributes {stable_mosaic.version = 11 : i64} {
  func.func @actor_kernel(%arg0: i32, %arg1: memref<8x128xbf16, #tpu.memory_space<vmem>>, %arg2: memref<3x128x128xbf16, #tpu.memory_space<vmem>>, %arg3: memref<3x128xf32, #tpu.memory_space<vmem>>, %arg4: memref<8x8xf32, #tpu.memory_space<vmem>>) attributes {dimension_semantics = [#tpu.dimension_semantics<parallel>], iteration_bounds = array<i64: 1>, scalar_prefetch = 0 : i64, scratch_operands = 0 : i64, tpu.core_type = #tpu.core_type<tc>, window_params = [{transform_indices = @transform_0, window_bounds = array<i64: 8, 128>}, {pipeline_mode = #tpu.pipeline_mode<synchronous>, transform_indices = @transform_1, window_bounds = array<i64: 3, 128, 128>}, {pipeline_mode = #tpu.pipeline_mode<synchronous>, transform_indices = @transform_2, window_bounds = array<i64: 3, 128>}, {transform_indices = @transform_3, window_bounds = array<i64: 8, 8>}]} {
    %c0 = arith.constant 0 : index
    %c0_0 = arith.constant 0 : index
    %0 = vector.load %arg1[%c0, %c0_0] : memref<8x128xbf16, #tpu.memory_space<vmem>>, vector<8x128xbf16>
    %c0_1 = arith.constant 0 : index
    %c0_2 = arith.constant 0 : index
    %1 = vector.load %arg3[%c0_1, %c0_2] : memref<3x128xf32, #tpu.memory_space<vmem>>, vector<3x128xf32>
    %c0_3 = arith.constant 0 : index
    %c0_4 = arith.constant 0 : index
    %c0_5 = arith.constant 0 : index
    %2 = vector.load %arg2[%c0_3, %c0_4, %c0_5] : memref<3x128x128xbf16, #tpu.memory_space<vmem>>, vector<1x128x128xbf16>
    %3 = vector.shape_cast %2 : vector<1x128x128xbf16> to vector<128x128xbf16>
    %cst = arith.constant dense<0.000000e+00> : vector<8x128xf32>
    %4 = tpu.matmul %0, %3, %cst {dimension_numbers = #tpu.dot_dimension_numbers<[1], [0], [0], [1], [0, 0, 1, 1], [], []>} : vector<8x128xbf16>, vector<128x128xbf16>, vector<8x128xf32> -> vector<8x128xf32>
    %5 = vector.extract_strided_slice %1 {offsets = [0, 0], sizes = [1, 128], strides = [1, 1]} : vector<3x128xf32> to vector<1x128xf32>
    %6 = vector.broadcast %5 : vector<1x128xf32> to vector<8x128xf32>
    %7 = arith.addf %4, %6 : vector<8x128xf32>
    %cst_6 = arith.constant 0.000000e+00 : f32
    %8 = vector.broadcast %cst_6 : f32 to vector<8x128xf32>
    %9 = arith.maximumf %7, %8 : vector<8x128xf32>
    %10 = arith.truncf %9 : vector<8x128xf32> to vector<8x128xbf16>
    %c1 = arith.constant 1 : index
    %c0_7 = arith.constant 0 : index
    %c0_8 = arith.constant 0 : index
    %11 = vector.load %arg2[%c1, %c0_7, %c0_8] : memref<3x128x128xbf16, #tpu.memory_space<vmem>>, vector<1x128x128xbf16>
    %12 = vector.shape_cast %11 : vector<1x128x128xbf16> to vector<128x128xbf16>
    %cst_9 = arith.constant dense<0.000000e+00> : vector<8x128xf32>
    %13 = tpu.matmul %10, %12, %cst_9 {dimension_numbers = #tpu.dot_dimension_numbers<[1], [0], [0], [1], [0, 0, 1, 1], [], []>} : vector<8x128xbf16>, vector<128x128xbf16>, vector<8x128xf32> -> vector<8x128xf32>
    %14 = vector.extract_strided_slice %1 {offsets = [1, 0], sizes = [1, 128], strides = [1, 1]} : vector<3x128xf32> to vector<1x128xf32>
    %15 = vector.broadcast %14 : vector<1x128xf32> to vector<8x128xf32>
    %16 = arith.addf %13, %15 : vector<8x128xf32>
    %cst_10 = arith.constant 0.000000e+00 : f32
    %17 = vector.broadcast %cst_10 : f32 to vector<8x128xf32>
    %18 = arith.maximumf %16, %17 : vector<8x128xf32>
    %19 = arith.truncf %18 : vector<8x128xf32> to vector<8x128xbf16>
    %c2 = arith.constant 2 : index
    %c0_11 = arith.constant 0 : index
    %c0_12 = arith.constant 0 : index
    %20 = vector.load %arg2[%c2, %c0_11, %c0_12] : memref<3x128x128xbf16, #tpu.memory_space<vmem>>, vector<1x128x128xbf16>
    %21 = vector.shape_cast %20 : vector<1x128x128xbf16> to vector<128x128xbf16>
    %cst_13 = arith.constant dense<0.000000e+00> : vector<8x128xf32>
    %22 = tpu.matmul %19, %21, %cst_13 {dimension_numbers = #tpu.dot_dimension_numbers<[1], [0], [0], [1], [0, 0, 1, 1], [], []>} : vector<8x128xbf16>, vector<128x128xbf16>, vector<8x128xf32> -> vector<8x128xf32>
    %23 = vector.extract_strided_slice %1 {offsets = [2, 0], sizes = [1, 128], strides = [1, 1]} : vector<3x128xf32> to vector<1x128xf32>
    %24 = vector.broadcast %23 : vector<1x128xf32> to vector<8x128xf32>
    %25 = arith.addf %22, %24 : vector<8x128xf32>
    %26 = tpu.iota {dimensions = array<i32: 1>} : vector<8x128xi32>
    %c6_i32 = arith.constant 6 : i32
    %27 = vector.broadcast %c6_i32 : i32 to vector<8x128xi32>
    %28 = arith.cmpi slt, %26, %27 : vector<8x128xi32>
    %cst_14 = arith.constant -1.000000e+30 : f32
    %29 = vector.broadcast %cst_14 : f32 to vector<8x128xf32>
    %30 = arith.select %28, %25, %29 : vector<8x128xi1>, vector<8x128xf32>
    %cst_15 = arith.constant dense<0xFF800000> : vector<8xf32>
    %31 = vector.multi_reduction <maximumf>, %30, %cst_15 [1] : vector<8x128xf32> to vector<8xf32>
    %32 = vector.shape_cast %31 : vector<8xf32> to vector<8x1xf32>
    %33 = vector.broadcast %32 : vector<8x1xf32> to vector<8x128xf32>
    %34 = arith.subf %30, %33 : vector<8x128xf32>
    %35 = math.exp %34 : vector<8x128xf32>
    %cst_16 = arith.constant dense<0.000000e+00> : vector<8xf32>
    %36 = vector.multi_reduction <add>, %35, %cst_16 [1] : vector<8x128xf32> to vector<8xf32>
    %37 = vector.shape_cast %36 : vector<8xf32> to vector<8x1xf32>
    %38 = vector.broadcast %37 : vector<8x1xf32> to vector<8x128xf32>
    %39 = arith.divf %35, %38 : vector<8x128xf32>
    %40 = vector.extract_strided_slice %39 {offsets = [0, 0], sizes = [8, 8], strides = [1, 1]} : vector<8x128xf32> to vector<8x8xf32>
    %c0_17 = arith.constant 0 : index
    %c0_18 = arith.constant 0 : index
    %41 = vector.load %arg4[%c0_17, %c0_18] : memref<8x8xf32, #tpu.memory_space<vmem>>, vector<8x8xf32>
    tpu.vector_store %arg4[%c0_17, %c0_18], %40 {strides = array<i32>} : memref<8x8xf32, #tpu.memory_space<vmem>>, vector<8x8xf32>,
    return
  }
  func.func @transform_0(%arg0: i32) -> (i32, i32) {
    %c0_i32 = arith.constant 0 : i32
    %c0_i32_0 = arith.constant 0 : i32
    return %arg0, %c0_i32 : i32, i32
  }
  func.func @transform_1(%arg0: i32) -> (i32, i32, i32) {
    %c0_i32 = arith.constant 0 : i32
    %c0_i32_0 = arith.constant 0 : i32
    %c0_i32_1 = arith.constant 0 : i32
    %c0_i32_2 = arith.constant 0 : i32
    return %c0_i32, %c0_i32_0, %c0_i32_1 : i32, i32, i32
  }
  func.func @transform_2(%arg0: i32) -> (i32, i32) {
    %c0_i32 = arith.constant 0 : i32
    %c0_i32_0 = arith.constant 0 : i32
    %c0_i32_1 = arith.constant 0 : i32
    return %c0_i32, %c0_i32_0 : i32, i32
  }
  func.func @transform_3(%arg0: i32) -> (i32, i32) {
    %c0_i32 = arith.constant 0 : i32
    %c0_i32_0 = arith.constant 0 : i32
    return %arg0, %c0_i32 : i32, i32
  }
}

</mosaic_0001>

<bundles_post_ra>
// kernel: _actor_forward_padded.1
= control target key start
LH: loop header
LB: loop body
LE: loop exit
PB: predicated region body
PF: predicated region fallthrough
CT: control target
= control target key end

     0   :  { %8 = vsyncpa [#allocation3], 0  ;;  %s726_s0 = inlined_call_operand.hbm [shape: bf16[8,128], index: 0, kind: input, shape index: {}]   ;;  %s727_s1 = inlined_call_operand.hbm [shape: bf16[3,128,128], index: 1, kind: input, shape index: {}]   ;;  %s728_s2 = inlined_call_operand.vmem [shape: f32[3,128], index: 2, kind: input, shape index: {}]   ;;  %s729_s3 = inlined_call_operand.hbm [shape: f32[8,8], index: 3, kind: output, shape index: {}]  }
   0x1   :  { %9 = vsyncpa [#allocation6], 0 }
   0x2   :  { %10 = vsyncpa [#allocation4], 0  ;;  %s623_s12 = smov [#allocation2]   ;;  %s624_s14 = smov [#allocation5]  }
   0x3   :  { %s17_s13 = sshll.u32 %s623_s12, 4  ;;  %s26_s15 = sshll.u32 %s624_s14, 4  ;;  %s18_s13 = int_to_ptr.vmem [resolvable:$true] %s17_s13  ;;  %s650_s15 = int_to_ptr.vmem [resolvable:$true] %s26_s15 }
   0x4   :  { %s551_s18 = scalar_lea.hbm %s726_s0, 64 }
   0x5   :  { %p552_p0 = scmp.ne.s32.totalorder %s726_s0, %s551_s18  ;;  %p555_p1 = scmp.lt.u32.totalorder %s551_s18, %s726_s0 }
   0x7   :  { %p557_p2 = pnand %p555_p1, %p552_p0 }
   0x9   :  { %560 = shalt.err (!%p557_p2)
}
   0xa   :  { %s561_s23 = scalar_lea.vmem %s18_s13, 64  ;;  %p566_p4 = scmp.lt.s32.totalorder %s18_s13, %s18_s13 }
   0xb   :  { %p562_p3 = scmp.ne.s32.totalorder %s18_s13, %s561_s23  ;;  %p567_p5 = scmp.lt.s32.totalorder %s561_s23, %s561_s23 }
   0xd   :  { %p568_p6 = por %p567_p5, %p566_p4 }
   0xf   :  { %p569_p7 = pnand %p568_p6, %p562_p3 }
  0x11   :  { %572 = shalt.err (!%p569_p7)
}
  0x12   :  { %20 = dma.hbm_to_vmem [thread:$0]  %s726_s0, 64, %s18_s13, [#allocation3]  }
  0x13   :  { %s573_s28 = scalar_lea.hbm %s727_s1, 3072 }
  0x14   :  { %p574_p8 = scmp.ne.s32.totalorder %s727_s1, %s573_s28  ;;  %p577_p9 = scmp.lt.u32.totalorder %s573_s28, %s727_s1 }
  0x16   :  { %p579_p10 = pnand %p577_p9, %p574_p8 }
  0x18   :  { %582 = shalt.err (!%p579_p10)
}
  0x19   :  { %s583_s6 = scalar_lea.vmem %s650_s15, 3072  ;;  %p588_p12 = scmp.lt.s32.totalorder %s650_s15, %s650_s15 }
  0x1a   :  { %p584_p11 = scmp.ne.s32.totalorder %s650_s15, %s583_s6  ;;  %p589_p13 = scmp.lt.s32.totalorder %s583_s6, %s583_s6 }
  0x1c   :  { %p590_p0 = por %p589_p13, %p588_p12 }
  0x1e   :  { %p591_p1 = pnand %p590_p0, %p584_p11 }
  0x20   :  { %594 = shalt.err (!%p591_p1)
}
  0x21   :  { %s625_s0 = smov 64   ;;  %s626_s7 = smov 4  }
  0x22   :  { %32 = dma.hbm_to_vmem [thread:$0]  %s727_s1, 3072, %s650_s15, [#allocation6], %s625_s0, %s625_s0, %s626_s7  }
  0x23   :  { %617 = dma.done.wait [#allocation3], 64  }
  0x24   :  { %618 = vsyncadd [#allocation3], 4294967232 }
  0x25   :  { %619 = dma.done.wait [#allocation6], 3072  }
  0x26   :  { %620 = vsyncadd [#allocation6], 4294964224  ;;  %v627_v0 = vmov 0.0   ;;  %vm628_vm0 = vmmov 0   ;;  %v523_v1 = vld [vmem:[#allocation5] sm:$0xff]   ;;  %v524_v2 = vld [vmem:[#allocation5 + $0x8] sm:$0xff]   ;;  %v60_v24 = vlaneseq }
  0x27   :  { %456 = vmatprep.subr.bf16.mxu0 %v627_v0  ;;  %472 = vmatprep.mubr.msk.bf16.mxu0 %vm628_vm0, %v627_v0  ;;  %v525_v3 = vld [vmem:[#allocation5 + $0x10] sm:$0xff]   ;;  %v531_v4 = vld [vmem:[#allocation5 + $0x40] sm:$0xff]   ;;  %v526_v5 = vld [vmem:[#allocation5 + $0x18] sm:$0xff]   ;;  %vm387_vm2 = vcmask 64512  }
  0x28   :  { %476 = vmatprep.subr.bf16.mxu1 %v627_v0  ;;  %492 = vmatprep.mubr.msk.bf16.mxu1 %vm628_vm0, %v627_v0  ;;  %v532_v6 = vld [vmem:[#allocation5 + $0x48] sm:$0xff]   ;;  %v527_v7 = vld [vmem:[#allocation5 + $0x20] sm:$0xff]   ;;  %v533_v8 = vld [vmem:[#allocation5 + $0x50] sm:$0xff]   ;;  %v61_v25 = vshrl.u32 %v60_v24, 7  ;;  %v375_v48 = vand.u32 127, %v60_v24 }
  0x29   :  { %457 = vmatpush3.bf16.msra.mxu0 %v523_v1  ;;  %477 = vmatpush3.bf16.msra.mxu1 %v531_v4  ;;  %v528_v9 = vld [vmem:[#allocation5 + $0x28] sm:$0xff]   ;;  %v534_v10 = vld [vmem:[#allocation5 + $0x58] sm:$0xff]   ;;  %v529_v11 = vld [vmem:[#allocation5 + $0x30] sm:$0xff]  }
  0x2a   :  { %458 = vmatprep.subr.bf16.mxu0 %v627_v0  ;;  %478 = vmatprep.subr.bf16.mxu1 %v627_v0  ;;  %v535_v12 = vld [vmem:[#allocation5 + $0x60] sm:$0xff]   ;;  %v530_v13 = vld [vmem:[#allocation5 + $0x38] sm:$0xff]   ;;  %v536_v14 = vld [vmem:[#allocation5 + $0x68] sm:$0xff]   ;;  %v62_v26 = vsub.s32 0, %v61_v25  ;;  %v173_v38 = vsub.s32 1, %v61_v25  ;;  %v284_v47 = vsub.s32 2, %v61_v25 }
  0x2b   :  { %v42_v15 = vld [vmem:[#allocation2] sm:$0xf]  ;;  %v537_v16 = vld [vmem:[#allocation5 + $0x70] sm:$0xff]   ;;  %v539_v18 = vld [vmem:[#allocation5 + $0x80] sm:$0xff]   ;;  %vm376_vm1 = vcmp.lt.s32.totalorder %v375_v48, 6 }
  0x2c   :  { %v538_v17 = vld [vmem:[#allocation5 + $0x78] sm:$0xff]   ;;  %v540_v19 = vld [vmem:[#allocation5 + $0x88] sm:$0xff]   ;;  %v541_v20 = vld [vmem:[#allocation5 + $0x90] sm:$0xff]  }
  0x2d   :  { %459 = vmatpush3.bf16.msra.mxu0 %v524_v2  ;;  %479 = vmatpush3.bf16.msra.mxu1 %v532_v6  ;;  %v542_v21 = vld [vmem:[#allocation5 + $0x98] sm:$0xff]   ;;  %v543_v22 = vld [vmem:[#allocation5 + $0xa0] sm:$0xff]   ;;  %v544_v23 = vld [vmem:[#allocation5 + $0xa8] sm:$0xff]  }
  0x2e   :  { %460 = vmatprep.subr.bf16.mxu0 %v627_v0  ;;  %480 = vmatprep.subr.bf16.mxu1 %v627_v0  ;;  %v43_v27 = vld [vmem:[%s728_s2] sm:$0x7]  ;;  %v545_v36 = vld [vmem:[#allocation5 + $0xb0] sm:$0xff]   ;;  %s629_s2 = smov [#allocation7]  }
  0x2f   :  { %v63_v28 = vrot.slane %v43_v27, %v62_v26  ;;  %v546_v37 = vld [vmem:[#allocation5 + $0xb8] sm:$0xff]   ;;  %v174_v39 = vrot.slane %v43_v27, %v173_v38  ;;  %v285_v49 = vrot.slane %v43_v27, %v284_v47  ;;  %s395_s11 = sshll.u32 %s629_s2, 4  ;;  %s396_s11 = int_to_ptr.vmem [resolvable:$true] %s395_s11 }
  0x30   :  { %s595_s12 = scalar_lea.vmem %s396_s11, 128  ;;  %p600_p3 = scmp.lt.s32.totalorder %s396_s11, %s396_s11 }
  0x31   :  { %461 = vmatpush3.bf16.msra.mxu0 %v525_v3  ;;  %481 = vmatpush3.bf16.msra.mxu1 %v533_v8  ;;  %p596_p2 = scmp.ne.s32.totalorder %s396_s11, %s595_s12  ;;  %p601_p4 = scmp.lt.s32.totalorder %s595_s12, %s595_s12 }
  0x32   :  { %462 = vmatprep.subr.bf16.mxu0 %v627_v0  ;;  %482 = vmatprep.subr.bf16.mxu1 %v627_v0 }
  0x33   :  { %p602_p5 = por %p601_p4, %p600_p3 }
  0x35   :  { %463 = vmatpush3.bf16.msra.mxu0 %v526_v5  ;;  %483 = vmatpush3.bf16.msra.mxu1 %v534_v10  ;;  %p603_p6 = pnand %p602_p5, %p596_p2 }
  0x36   :  { %464 = vmatprep.subr.bf16.mxu0 %v627_v0  ;;  %484 = vmatprep.subr.bf16.mxu1 %v627_v0 }
  0x39   :  { %465 = vmatpush3.bf16.msra.mxu0 %v527_v7  ;;  %485 = vmatpush3.bf16.msra.mxu1 %v535_v12 }
  0x3a   :  { %466 = vmatprep.subr.bf16.mxu0 %v627_v0  ;;  %486 = vmatprep.subr.bf16.mxu1 %v627_v0 }
  0x3d   :  { %467 = vmatpush3.bf16.msra.mxu0 %v528_v9  ;;  %487 = vmatpush3.bf16.msra.mxu1 %v536_v14 }
  0x3e   :  { %468 = vmatprep.subr.bf16.mxu0 %v627_v0  ;;  %488 = vmatprep.subr.bf16.mxu1 %v627_v0 }
  0x41   :  { %469 = vmatpush3.bf16.msra.mxu0 %v529_v11  ;;  %489 = vmatpush3.bf16.msra.mxu1 %v537_v16 }
  0x42   :  { %470 = vmatprep.subr.bf16.mxu0 %v627_v0  ;;  %490 = vmatprep.subr.bf16.mxu1 %v627_v0 }
  0x45   :  { %471 = vmatpush3.bf16.msra.mxu0 %v530_v13  ;;  %491 = vmatpush3.bf16.msra.mxu1 %v538_v17 }
  0x46   :  { %496 = vmatprep.subr.bf16.mxu0 %v627_v0 }
  0x48   :  { %473 = vmatmul.mubr.bf16.vlgmr.msra.gmra.mrb[0].mxu0 %v42_v15 }
  0x49   :  { %512 = vmatprep.mubr.msk.bf16.mxu0 %vm628_vm0, %v627_v0  ;;  %497 = vmatpush3.bf16.msra.mxu0 %v539_v18 }
  0x4a   :  { %498 = vmatprep.subr.bf16.mxu0 %v627_v0 }
  0x4d   :  { %499 = vmatpush3.bf16.msra.mxu0 %v540_v19 }
  0x4e   :  { %500 = vmatprep.subr.bf16.mxu0 %v627_v0 }
  0x51   :  { %501 = vmatpush3.bf16.msra.mxu0 %v541_v20 }
  0x52   :  { %502 = vmatprep.subr.bf16.mxu0 %v627_v0 }
  0x55   :  { %503 = vmatpush3.bf16.msra.mxu0 %v542_v21 }
  0x56   :  { %504 = vmatprep.subr.bf16.mxu0 %v627_v0 }
  0x59   :  { %505 = vmatpush3.bf16.msra.mxu0 %v543_v22 }
  0x5a   :  { %506 = vmatprep.subr.bf16.mxu0 %v627_v0 }
  0x5d   :  { %507 = vmatpush3.bf16.msra.mxu0 %v544_v23 }
  0x5e   :  { %508 = vmatprep.subr.bf16.mxu0 %v627_v0 }
  0x61   :  { %509 = vmatpush3.bf16.msra.mxu0 %v545_v36 }
  0x62   :  { %510 = vmatprep.subr.bf16.mxu0 %v627_v0 }
  0x65   :  { %511 = vmatpush3.bf16.msra.mxu0 %v546_v37 }
 0x11b   :  { %v146_v29 = vpop.f32.mrb[0].mxu0 }
 0x11c   :  { %v147_v30 = vadd.f32 %v146_v29, %v63_v28  ;;  %v474_v31 = vpop.f32.mrb[1].mxu0 }
 0x11d   :  { %v149_v32 = vpop.f32.mrb[2].mxu0 }
 0x11e   :  { %v152_v33 = vmax.f32 %v147_v30, 0.0  ;;  %v475_v34 = vpop.f32.mrb[3].mxu0 }
 0x120   :  { %v153_v35 = vpack.c.bf16 %v152_v33, %v152_v33 }
 0x122   :  { %493 = vmatmul.mubr.bf16.vlgmr.msra.gmra.mrb[0].mxu1 %v153_v35 }
 0x1f5   :  { %v257_v40 = vpop.f32.mrb[0].mxu1 }
 0x1f6   :  { %v258_v41 = vadd.f32 %v257_v40, %v174_v39  ;;  %v494_v42 = vpop.f32.mrb[1].mxu1 }
 0x1f7   :  { %v260_v43 = vpop.f32.mrb[2].mxu1 }
 0x1f8   :  { %v263_v44 = vmax.f32 %v258_v41, 0.0  ;;  %v495_v45 = vpop.f32.mrb[3].mxu1 }
 0x1fa   :  { %v264_v46 = vpack.c.bf16 %v263_v44, %v263_v44 }
 0x1fc   :  { %513 = vmatmul.mubr.bf16.vlgmr.msra.gmra.mrb[4].mxu0 %v264_v46 }
 0x2cf   :  { %v368_v50 = vpop.f32.mrb[4].mxu0 }
 0x2d0   :  { %v369_v51 = vadd.f32 %v368_v50, %v285_v49  ;;  %v514_v52 = vpop.f32.mrb[5].mxu0 }
 0x2d1   :  { %v371_v53 = vpop.f32.mrb[6].mxu0 }
 0x2d2   :  { %v515_v54 = vpop.f32.mrb[7].mxu0  ;;  %v377_v55 = vsel %vm376_vm1, %v369_v51, -1e+30 }
 0x2d3   :  { %378 = vmax.xlane.f32.xlu0 %v377_v55 }
 0x360   :  { %v379_v56 = vpop.xlane.xlu0 %378 }
 0x361   :  { %v380_v57 = vsub.f32 %v377_v55, %v379_v56 }
 0x363   :  { %v381_v58 = vmul.f32 1.442695, %v380_v57 }
 0x365   :  { %547 = vpow2.f32 %v381_v58 }
 0x36f   :  { %v548_v59 = vpop.eup %547 }
 0x370   :  { %383 = vadd.xlane.f32.xlu0 %v548_v59 }
 0x3fd   :  { %v384_v60 = vpop.xlane.xlu0 %383 }
 0x3fe   :  { %549 = vrcp.f32 %v384_v60 }
 0x408   :  { %v550_v61 = vpop.eup %549 }
 0x409   :  { %v386_v62 = vmul.f32 %v550_v61, %v548_v59 }
 0x40b   :  { %388 = vst.msk [vmem:[#allocation7] sm:$0xff] %vm387_vm2, %v386_v62 }
 0x40c   :  { %606 = shalt.err (!%p603_p6)
}
 0x40d   :  { %s607_s15 = scalar_lea.hbm %s729_s3, 128 }
 0x40e   :  { %p608_p7 = scmp.ne.s32.totalorder %s729_s3, %s607_s15  ;;  %p611_p8 = scmp.lt.u32.totalorder %s607_s15, %s729_s3 }
 0x410   :  { %p613_p9 = pnand %p611_p8, %p608_p7 }
 0x412   :  { %616 = shalt.err (!%p613_p9)
}
 0x413   :  { %398 = dma.vmem_to_hbm [thread:$0]  %s396_s11, 128, %s729_s3, [#allocation4]  }
 0x414   :  { %621 = dma.done.wait [#allocation4], 128  }
 0x415   :  { %622 = vsyncadd [#allocation4], 4294967168 }
 0x416   :  { %402 = vsyncpa [#allocation3], 1 }
 0x417   :  { %403 = vsyncpa [#allocation6], 1 }
 0x418   :  { %404 = vsyncpa [#allocation4], 1 }

</bundles_post_ra>
